<compile_context>
chip_gen: v7x
topology: tpu7x:2x2x1
jax: 0.10.0
libtpu: 0.0.40
codegen_flags: <defaults>
</compile_context>

<pallas_src>
import math

import numpy as np
import jax
import jax.numpy as jnp
from jax.experimental import pallas as pl
from jax.experimental.pallas import tpu as pltpu

_LN_EPS = 1e-5


# ----------------------------------------------------------------------------
# Kernel
# ----------------------------------------------------------------------------
def _make_mlp_kernel(num_layers, d_real, d_pad, unroll_limit=4):
    """Fused (Linear -> LayerNorm -> ReLU) x num_layers kernel body."""
    inv_d = 1.0 / float(d_real)
    masked = d_real != d_pad

    def layer(h, w_bf16, pgb):
        # bf16 MXU matmul, f32 accumulation.
        y = jnp.dot(h.astype(jnp.bfloat16), w_bf16,
                    preferred_element_type=jnp.float32)
        y = y + pgb[0:1, :]                            # bias

        # LayerNorm over the *real* feature count (padded cols of y are 0,
        # so they contribute nothing to the sums).
        mean = jnp.sum(y, axis=-1, keepdims=True) * inv_d
        c = y - mean
        if masked:
            lane = jax.lax.broadcasted_iota(jnp.int32, c.shape, 1)
            cm = jnp.where(lane < d_real, c, 0.0)
        else:
            cm = c
        var = jnp.sum(cm * cm, axis=-1, keepdims=True) * inv_d
        y = c * jax.lax.rsqrt(var + _LN_EPS)
        y = y * pgb[1:2, :] + pgb[2:3, :]              # gamma/beta (padded -> 0)
        return jnp.maximum(y, 0.0)                     # ReLU

    if num_layers == 1:
        def kernel(x_ref, w0_ref, pgb_ref, o_ref):
            h = layer(x_ref[...], w0_ref[...], pgb_ref[0])
            o_ref[...] = h.astype(o_ref.dtype)
    elif num_layers <= unroll_limit:
        def kernel(x_ref, w0_ref, ws_ref, pgb_ref, o_ref):
            h = layer(x_ref[...], w0_ref[...], pgb_ref[0])
            for li in range(1, num_layers):            # static unroll, small L
                h = layer(h, ws_ref[li - 1], pgb_ref[li])
            o_ref[...] = h.astype(o_ref.dtype)
    else:
        def kernel(x_ref, w0_ref, ws_ref, pgb_ref, o_ref):
            h = layer(x_ref[...], w0_ref[...], pgb_ref[0])

            def body(li, hh):
                return layer(hh, ws_ref[li - 1], pgb_ref[li])

            h = jax.lax.fori_loop(1, num_layers, body, h)
            o_ref[...] = h.astype(o_ref.dtype)

    return kernel


def _choose_batch_tile(B, batch_tile):
    bt = min(batch_tile, B)
    if B >= 256:
        # Keep >= 2 grid steps so both v7x TensorCores get work.
        bt = min(bt, pl.cdiv(B, 2))
    if bt >= 128:
        bt = (bt // 128) * 128                # MXU M-dim alignment
    else:
        bt = max(8, ((bt + 7) // 8) * 8)      # sublane alignment, small batches
    return bt


# ----------------------------------------------------------------------------
# Wrapper
# ----------------------------------------------------------------------------
def mlp_forward(x, w0, ws, pgb, *, d_real, batch_tile=512,
                out_dtype=jnp.float32):
    """Fused MLP forward.

    x:      [B, Din] (any float dtype; streamed as bf16)
    w0:     [Din, Dp] bf16              (first Linear, stored transposed, padded)
    ws:     [L-1, Dp, Dp] bf16 or None  (remaining Linears, transposed, padded)
    pgb:    [L, 3, Dp] f32              (bias / gamma / beta, zero-padded)
    d_real: real num_channels (static)  -> output is [B, d_real]
    """
    B, Din = x.shape
    L, _, Dp = pgb.shape
    num_layers = L

    bt = _choose_batch_tile(B, batch_tile)
    n_tiles = pl.cdiv(B, bt)

    # Stream the activation tile in bf16 (halves per-step input DMA bytes).
    xb = x.astype(jnp.bfloat16)

    inputs = [xb, w0]
    in_specs = [
        pl.BlockSpec((bt, Din), lambda i: (i, 0)),              # pipelined
        pl.BlockSpec((Din, Dp), lambda i: (0, 0),
                     pipeline_mode=pl.Buffered(1)),             # resident once
    ]
    if num_layers > 1:
        inputs.append(ws)
        in_specs.append(pl.BlockSpec((L - 1, Dp, Dp), lambda i: (0, 0, 0),
                                     pipeline_mode=pl.Buffered(1)))
    inputs.append(pgb)
    in_specs.append(pl.BlockSpec((L, 3, Dp), lambda i: (0, 0, 0),
                                 pipeline_mode=pl.Buffered(1)))

    # VMEM budget: resident weights (single-buffered) + double-buffered x/out.
    w_bytes = (w0.size * w0.dtype.itemsize
               + pgb.size * pgb.dtype.itemsize
               + (ws.size * ws.dtype.itemsize if ws is not None else 0))
    io_bytes = 2 * bt * Din * 2 + 2 * bt * Dp * np.dtype(out_dtype).itemsize
    vmem_limit = int(min(max(2 * (w_bytes + io_bytes) + (2 << 20), 32 << 20),
                         56 << 20))

    out = pl.pallas_call(
        _make_mlp_kernel(num_layers, d_real, Dp),
        out_shape=jax.ShapeDtypeStruct((B, Dp), out_dtype),
        grid_spec=pltpu.PrefetchScalarGridSpec(
            num_scalar_prefetch=0,
            grid=(n_tiles,),
            in_specs=in_specs,
            out_specs=pl.BlockSpec((bt, Dp), lambda i: (i, 0)),
        ),
        compiler_params=pltpu.CompilerParams(
            dimension_semantics=("parallel",),
            vmem_limit_bytes=vmem_limit,
        ),
    )(*inputs)

    return out[:, :d_real] if Dp != d_real else out


mlp_forward_jit = jax.jit(
    mlp_forward, static_argnames=("d_real", "batch_tile", "out_dtype"))


# ----------------------------------------------------------------------------
# Parameter construction (mirrors the PyTorch module's init) and reference
# ----------------------------------------------------------------------------
def init_mlp_params(key, input_dim, num_channels, num_layers):
    """kaiming-normal (gain=sqrt(2)) Linear weights, zero bias, LN gamma=1 /
    beta=0.  Weights stored transposed: [in, out], f32, unpadded."""
    params = []
    dims = [input_dim] + [num_channels] * num_layers
    gain = math.sqrt(2.0)
    for li in range(num_layers):
        fan_in, fan_out = dims[li], dims[li + 1]
        key, sub = jax.random.split(key)
        std = gain / math.sqrt(fan_in)
        w = (jax.random.normal(sub, (fan_out, fan_in), dtype=jnp.float32) * std).T
        b = jnp.zeros((fan_out,), dtype=jnp.float32)
        gamma = jnp.ones((fan_out,), dtype=jnp.float32)
        beta = jnp.zeros((fan_out,), dtype=jnp.float32)
        params.append((w, b, gamma, beta))
    return params


def pack_params(params, lane=128):
    """list of (w, b, gamma, beta) -> (w0 bf16, ws bf16|None, pgb f32, d_real).

    Pads the feature dim to a multiple of 128 (lane-dense stores, MXU-N fill).
    Padded gamma/beta/bias/weight columns are zero so padded activations stay 0.
    """
    D = params[0][1].shape[0]
    Dp = ((D + lane - 1) // lane) * lane
    pad = Dp - D

    w0 = jnp.pad(params[0][0], ((0, 0), (0, pad))).astype(jnp.bfloat16)
    if len(params) > 1:
        ws = jnp.stack([jnp.pad(p[0], ((0, pad), (0, pad)))
                        for p in params[1:]]).astype(jnp.bfloat16)
    else:
        ws = None
    pgb = jnp.stack([
        jnp.stack([jnp.pad(b, (0, pad)),
                   jnp.pad(g, (0, pad)),
                   jnp.pad(be, (0, pad))])
        for (_, b, g, be) in params
    ]).astype(jnp.float32)
    return w0, ws, pgb, D


def mlp_reference(x, params, matmul_dtype=jnp.float32):
    """Pure-JAX reference (unpadded).  matmul_dtype=bf16 mirrors the kernel."""
    h = x
    for (w, b, g, be) in params:
        h = jnp.dot(h.astype(matmul_dtype), w.astype(matmul_dtype),
                    preferred_element_type=jnp.float32) + b
        mean = jnp.mean(h, axis=-1, keepdims=True)
        var = jnp.mean((h - mean) ** 2, axis=-1, keepdims=True)
        h = (h - mean) * jax.lax.rsqrt(var + _LN_EPS) * g + be
        h = jnp.maximum(h, 0.0)
    return h


# ----------------------------------------------------------------------------
if __name__ == "__main__":
    batch = 100          # not a multiple of the tile -> exercises partial blocks
    input_dim = 16
    num_channels = 32    # < 128 -> exercises lane padding + masked LayerNorm
    num_layers = 3
    batch_tile = 64      # grid = (2,) -> pipelined + megacore-splittable

    key = jax.random.PRNGKey(0)
    kx, kp = jax.random.split(key)
    x = jax.random.normal(kx, (batch, input_dim), dtype=jnp.float32)
    params = init_mlp_params(kp, input_dim, num_channels, num_layers)
    w0, ws, pgb, d_real = pack_params(params)

    out = mlp_forward_jit(x, w0, ws, pgb, d_real=d_real, batch_tile=batch_tile)
    out = jax.block_until_ready(out)
    assert out.shape == (batch, num_channels)
    assert bool(jnp.all(jnp.isfinite(out)))

    # Strict check vs. a reference that uses the same bf16 matmul inputs.
    ref_bf16 = mlp_reference(x, params, matmul_dtype=jnp.bfloat16)
    assert jnp.allclose(out, ref_bf16, atol=2e-3, rtol=2e-3), (
        float(jnp.max(jnp.abs(out - ref_bf16))))

    # Loose sanity check vs. the full-f32 reference (kernel uses bf16 MXU inputs).
    ref_f32 = mlp_reference(x, params, matmul_dtype=jnp.float32)
    assert jnp.allclose(out, ref_f32, atol=1e-1, rtol=1e-1), (
        float(jnp.max(jnp.abs(out - ref_f32))))

    print("KERNEL_OK")
</pallas_src>

<mosaic_0001>
module attributes {stable_mosaic.version = 11 : i64} {
  func.func @kernel(%arg0: i32, %arg1: memref<64x16xbf16, #tpu.memory_space<vmem>>, %arg2: memref<16x128xbf16, #tpu.memory_space<vmem>>, %arg3: memref<2x128x128xbf16, #tpu.memory_space<vmem>>, %arg4: memref<3x3x128xf32, #tpu.memory_space<vmem>>, %arg5: memref<64x128xf32, #tpu.memory_space<vmem>>) attributes {dimension_semantics = [#tpu.dimension_semantics<parallel>], iteration_bounds = array<i64: 2>, scalar_prefetch = 0 : i64, scratch_operands = 0 : i64, tpu.core_type = #tpu.core_type<tc>, window_params = [{transform_indices = @transform_0, window_bounds = array<i64: 64, 16>}, {pipeline_mode = #tpu.pipeline_mode<synchronous>, transform_indices = @transform_1, window_bounds = array<i64: 16, 128>}, {pipeline_mode = #tpu.pipeline_mode<synchronous>, transform_indices = @transform_2, window_bounds = array<i64: 2, 128, 128>}, {pipeline_mode = #tpu.pipeline_mode<synchronous>, transform_indices = @transform_3, window_bounds = array<i64: 3, 3, 128>}, {transform_indices = @transform_4, window_bounds = array<i64: 64, 128>}]} {
    %c0 = arith.constant 0 : index
    %c0_0 = arith.constant 0 : index
    %0 = vector.load %arg1[%c0, %c0_0] : memref<64x16xbf16, #tpu.memory_space<vmem>>, vector<64x16xbf16>
    %c0_1 = arith.constant 0 : index
    %c0_2 = arith.constant 0 : index
    %1 = vector.load %arg2[%c0_1, %c0_2] : memref<16x128xbf16, #tpu.memory_space<vmem>>, vector<16x128xbf16>
    %c0_3 = arith.constant 0 : index
    %c0_4 = arith.constant 0 : index
    %c0_5 = arith.constant 0 : index
    %2 = vector.load %arg4[%c0_3, %c0_4, %c0_5] : memref<3x3x128xf32, #tpu.memory_space<vmem>>, vector<1x3x128xf32>
    %3 = vector.shape_cast %2 : vector<1x3x128xf32> to vector<3x128xf32>
    %cst = arith.constant dense<0.000000e+00> : vector<64x128xf32>
    %4 = tpu.matmul %0, %1, %cst {dimension_numbers = #tpu.dot_dimension_numbers<[1], [0], [0], [1], [0, 0, 1, 1], [], []>} : vector<64x16xbf16>, vector<16x128xbf16>, vector<64x128xf32> -> vector<64x128xf32>
    %5 = vector.extract_strided_slice %3 {offsets = [0, 0], sizes = [1, 128], strides = [1, 1]} : vector<3x128xf32> to vector<1x128xf32>
    %6 = vector.broadcast %5 : vector<1x128xf32> to vector<64x128xf32>
    %7 = arith.addf %4, %6 : vector<64x128xf32>
    %cst_6 = arith.constant dense<0.000000e+00> : vector<64xf32>
    %8 = vector.multi_reduction <add>, %7, %cst_6 [1] : vector<64x128xf32> to vector<64xf32>
    %9 = vector.shape_cast %8 : vector<64xf32> to vector<64x1xf32>
    %cst_7 = arith.constant 3.125000e-02 : f32
    %10 = vector.broadcast %cst_7 : f32 to vector<64x1xf32>
    %11 = arith.mulf %9, %10 : vector<64x1xf32>
    %12 = vector.broadcast %11 : vector<64x1xf32> to vector<64x128xf32>
    %13 = arith.subf %7, %12 : vector<64x128xf32>
    %14 = tpu.iota {dimensions = array<i32: 1>} : vector<64x128xi32>
    %c32_i32 = arith.constant 32 : i32
    %15 = vector.broadcast %c32_i32 : i32 to vector<64x128xi32>
    %16 = arith.cmpi slt, %14, %15 : vector<64x128xi32>
    %cst_8 = arith.constant 0.000000e+00 : f32
    %17 = vector.broadcast %cst_8 : f32 to vector<64x128xf32>
    %18 = arith.select %16, %13, %17 : vector<64x128xi1>, vector<64x128xf32>
    %19 = arith.mulf %18, %18 : vector<64x128xf32>
    %cst_9 = arith.constant dense<0.000000e+00> : vector<64xf32>
    %20 = vector.multi_reduction <add>, %19, %cst_9 [1] : vector<64x128xf32> to vector<64xf32>
    %21 = vector.shape_cast %20 : vector<64xf32> to vector<64x1xf32>
    %cst_10 = arith.constant 3.125000e-02 : f32
    %22 = vector.broadcast %cst_10 : f32 to vector<64x1xf32>
    %23 = arith.mulf %21, %22 : vector<64x1xf32>
    %cst_11 = arith.constant 9.99999974E-6 : f32
    %24 = vector.broadcast %cst_11 : f32 to vector<64x1xf32>
    %25 = arith.addf %23, %24 : vector<64x1xf32>
    %26 = math.rsqrt %25 : vector<64x1xf32>
    %27 = vector.broadcast %26 : vector<64x1xf32> to vector<64x128xf32>
    %28 = arith.mulf %13, %27 : vector<64x128xf32>
    %29 = vector.extract_strided_slice %3 {offsets = [1, 0], sizes = [1, 128], strides = [1, 1]} : vector<3x128xf32> to vector<1x128xf32>
    %30 = vector.broadcast %29 : vector<1x128xf32> to vector<64x128xf32>
    %31 = arith.mulf %28, %30 : vector<64x128xf32>
    %32 = vector.extract_strided_slice %3 {offsets = [2, 0], sizes = [1, 128], strides = [1, 1]} : vector<3x128xf32> to vector<1x128xf32>
    %33 = vector.broadcast %32 : vector<1x128xf32> to vector<64x128xf32>
    %34 = arith.addf %31, %33 : vector<64x128xf32>
    %cst_12 = arith.constant 0.000000e+00 : f32
    %35 = vector.broadcast %cst_12 : f32 to vector<64x128xf32>
    %36 = arith.maximumf %34, %35 : vector<64x128xf32>
    %c0_13 = arith.constant 0 : index
    %c0_14 = arith.constant 0 : index
    %c0_15 = arith.constant 0 : index
    %37 = vector.load %arg3[%c0_13, %c0_14, %c0_15] : memref<2x128x128xbf16, #tpu.memory_space<vmem>>, vector<1x128x128xbf16>
    %38 = vector.shape_cast %37 : vector<1x128x128xbf16> to vector<128x128xbf16>
    %c1 = arith.constant 1 : index
    %c0_16 = arith.constant 0 : index
    %c0_17 = arith.constant 0 : index
    %39 = vector.load %arg4[%c1, %c0_16, %c0_17] : memref<3x3x128xf32, #tpu.memory_space<vmem>>, vector<1x3x128xf32>
    %40 = vector.shape_cast %39 : vector<1x3x128xf32> to vector<3x128xf32>
    %41 = arith.truncf %36 : vector<64x128xf32> to vector<64x128xbf16>
    %cst_18 = arith.constant dense<0.000000e+00> : vector<64x128xf32>
    %42 = tpu.matmul %41, %38, %cst_18 {dimension_numbers = #tpu.dot_dimension_numbers<[1], [0], [0], [1], [0, 0, 1, 1], [], []>} : vector<64x128xbf16>, vector<128x128xbf16>, vector<64x128xf32> -> vector<64x128xf32>
    %43 = vector.extract_strided_slice %40 {offsets = [0, 0], sizes = [1, 128], strides = [1, 1]} : vector<3x128xf32> to vector<1x128xf32>
    %44 = vector.broadcast %43 : vector<1x128xf32> to vector<64x128xf32>
    %45 = arith.addf %42, %44 : vector<64x128xf32>
    %cst_19 = arith.constant dense<0.000000e+00> : vector<64xf32>
    %46 = vector.multi_reduction <add>, %45, %cst_19 [1] : vector<64x128xf32> to vector<64xf32>
    %47 = vector.shape_cast %46 : vector<64xf32> to vector<64x1xf32>
    %cst_20 = arith.constant 3.125000e-02 : f32
    %48 = vector.broadcast %cst_20 : f32 to vector<64x1xf32>
    %49 = arith.mulf %47, %48 : vector<64x1xf32>
    %50 = vector.broadcast %49 : vector<64x1xf32> to vector<64x128xf32>
    %51 = arith.subf %45, %50 : vector<64x128xf32>
    %52 = tpu.iota {dimensions = array<i32: 1>} : vector<64x128xi32>
    %c32_i32_21 = arith.constant 32 : i32
    %53 = vector.broadcast %c32_i32_21 : i32 to vector<64x128xi32>
    %54 = arith.cmpi slt, %52, %53 : vector<64x128xi32>
    %cst_22 = arith.constant 0.000000e+00 : f32
    %55 = vector.broadcast %cst_22 : f32 to vector<64x128xf32>
    %56 = arith.select %54, %51, %55 : vector<64x128xi1>, vector<64x128xf32>
    %57 = arith.mulf %56, %56 : vector<64x128xf32>
    %cst_23 = arith.constant dense<0.000000e+00> : vector<64xf32>
    %58 = vector.multi_reduction <add>, %57, %cst_23 [1] : vector<64x128xf32> to vector<64xf32>
    %59 = vector.shape_cast %58 : vector<64xf32> to vector<64x1xf32>
    %cst_24 = arith.constant 3.125000e-02 : f32
    %60 = vector.broadcast %cst_24 : f32 to vector<64x1xf32>
    %61 = arith.mulf %59, %60 : vector<64x1xf32>
    %cst_25 = arith.constant 9.99999974E-6 : f32
    %62 = vector.broadcast %cst_25 : f32 to vector<64x1xf32>
    %63 = arith.addf %61, %62 : vector<64x1xf32>
    %64 = math.rsqrt %63 : vector<64x1xf32>
    %65 = vector.broadcast %64 : vector<64x1xf32> to vector<64x128xf32>
    %66 = arith.mulf %51, %65 : vector<64x128xf32>
    %67 = vector.extract_strided_slice %40 {offsets = [1, 0], sizes = [1, 128], strides = [1, 1]} : vector<3x128xf32> to vector<1x128xf32>
    %68 = vector.broadcast %67 : vector<1x128xf32> to vector<64x128xf32>
    %69 = arith.mulf %66, %68 : vector<64x128xf32>
    %70 = vector.extract_strided_slice %40 {offsets = [2, 0], sizes = [1, 128], strides = [1, 1]} : vector<3x128xf32> to vector<1x128xf32>
    %71 = vector.broadcast %70 : vector<1x128xf32> to vector<64x128xf32>
    %72 = arith.addf %69, %71 : vector<64x128xf32>
    %cst_26 = arith.constant 0.000000e+00 : f32
    %73 = vector.broadcast %cst_26 : f32 to vector<64x128xf32>
    %74 = arith.maximumf %72, %73 : vector<64x128xf32>
    %c1_27 = arith.constant 1 : index
    %c0_28 = arith.constant 0 : index
    %c0_29 = arith.constant 0 : index
    %75 = vector.load %arg3[%c1_27, %c0_28, %c0_29] : memref<2x128x128xbf16, #tpu.memory_space<vmem>>, vector<1x128x128xbf16>
    %76 = vector.shape_cast %75 : vector<1x128x128xbf16> to vector<128x128xbf16>
    %c2 = arith.constant 2 : index
    %c0_30 = arith.constant 0 : index
    %c0_31 = arith.constant 0 : index
    %77 = vector.load %arg4[%c2, %c0_30, %c0_31] : memref<3x3x128xf32, #tpu.memory_space<vmem>>, vector<1x3x128xf32>
    %78 = vector.shape_cast %77 : vector<1x3x128xf32> to vector<3x128xf32>
    %79 = arith.truncf %74 : vector<64x128xf32> to vector<64x128xbf16>
    %cst_32 = arith.constant dense<0.000000e+00> : vector<64x128xf32>
    %80 = tpu.matmul %79, %76, %cst_32 {dimension_numbers = #tpu.dot_dimension_numbers<[1], [0], [0], [1], [0, 0, 1, 1], [], []>} : vector<64x128xbf16>, vector<128x128xbf16>, vector<64x128xf32> -> vector<64x128xf32>
    %81 = vector.extract_strided_slice %78 {offsets = [0, 0], sizes = [1, 128], strides = [1, 1]} : vector<3x128xf32> to vector<1x128xf32>
    %82 = vector.broadcast %81 : vector<1x128xf32> to vector<64x128xf32>
    %83 = arith.addf %80, %82 : vector<64x128xf32>
    %cst_33 = arith.constant dense<0.000000e+00> : vector<64xf32>
    %84 = vector.multi_reduction <add>, %83, %cst_33 [1] : vector<64x128xf32> to vector<64xf32>
    %85 = vector.shape_cast %84 : vector<64xf32> to vector<64x1xf32>
    %cst_34 = arith.constant 3.125000e-02 : f32
    %86 = vector.broadcast %cst_34 : f32 to vector<64x1xf32>
    %87 = arith.mulf %85, %86 : vector<64x1xf32>
    %88 = vector.broadcast %87 : vector<64x1xf32> to vector<64x128xf32>
    %89 = arith.subf %83, %88 : vector<64x128xf32>
    %90 = tpu.iota {dimensions = array<i32: 1>} : vector<64x128xi32>
    %c32_i32_35 = arith.constant 32 : i32
    %91 = vector.broadcast %c32_i32_35 : i32 to vector<64x128xi32>
    %92 = arith.cmpi slt, %90, %91 : vector<64x128xi32>
    %cst_36 = arith.constant 0.000000e+00 : f32
    %93 = vector.broadcast %cst_36 : f32 to vector<64x128xf32>
    %94 = arith.select %92, %89, %93 : vector<64x128xi1>, vector<64x128xf32>
    %95 = arith.mulf %94, %94 : vector<64x128xf32>
    %cst_37 = arith.constant dense<0.000000e+00> : vector<64xf32>
    %96 = vector.multi_reduction <add>, %95, %cst_37 [1] : vector<64x128xf32> to vector<64xf32>
    %97 = vector.shape_cast %96 : vector<64xf32> to vector<64x1xf32>
    %cst_38 = arith.constant 3.125000e-02 : f32
    %98 = vector.broadcast %cst_38 : f32 to vector<64x1xf32>
    %99 = arith.mulf %97, %98 : vector<64x1xf32>
    %cst_39 = arith.constant 9.99999974E-6 : f32
    %100 = vector.broadcast %cst_39 : f32 to vector<64x1xf32>
    %101 = arith.addf %99, %100 : vector<64x1xf32>
    %102 = math.rsqrt %101 : vector<64x1xf32>
    %103 = vector.broadcast %102 : vector<64x1xf32> to vector<64x128xf32>
    %104 = arith.mulf %89, %103 : vector<64x128xf32>
    %105 = vector.extract_strided_slice %78 {offsets = [1, 0], sizes = [1, 128], strides = [1, 1]} : vector<3x128xf32> to vector<1x128xf32>
    %106 = vector.broadcast %105 : vector<1x128xf32> to vector<64x128xf32>
    %107 = arith.mulf %104, %106 : vector<64x128xf32>
    %108 = vector.extract_strided_slice %78 {offsets = [2, 0], sizes = [1, 128], strides = [1, 1]} : vector<3x128xf32> to vector<1x128xf32>
    %109 = vector.broadcast %108 : vector<1x128xf32> to vector<64x128xf32>
    %110 = arith.addf %107, %109 : vector<64x128xf32>
    %cst_40 = arith.constant 0.000000e+00 : f32
    %111 = vector.broadcast %cst_40 : f32 to vector<64x128xf32>
    %112 = arith.maximumf %110, %111 : vector<64x128xf32>
    %c0_41 = arith.constant 0 : index
    %c0_42 = arith.constant 0 : index
    %113 = vector.load %arg5[%c0_41, %c0_42] : memref<64x128xf32, #tpu.memory_space<vmem>>, vector<64x128xf32>
    tpu.vector_store %arg5[%c0_41, %c0_42], %112 {strides = array<i32>} : memref<64x128xf32, #tpu.memory_space<vmem>>, vector<64x128xf32>,
    return
  }
  func.func @transform_0(%arg0: i32) -> (i32, i32) {
    %c0_i32 = arith.constant 0 : i32
    %c0_i32_0 = arith.constant 0 : i32
    return %arg0, %c0_i32 : i32, i32
  }
  func.func @transform_1(%arg0: i32) -> (i32, i32) {
    %c0_i32 = arith.constant 0 : i32
    %c0_i32_0 = arith.constant 0 : i32
    %c0_i32_1 = arith.constant 0 : i32
    return %c0_i32, %c0_i32_0 : i32, i32
  }
  func.func @transform_2(%arg0: i32) -> (i32, i32, i32) {
    %c0_i32 = arith.constant 0 : i32
    %c0_i32_0 = arith.constant 0 : i32
    %c0_i32_1 = arith.constant 0 : i32
    %c0_i32_2 = arith.constant 0 : i32
    return %c0_i32, %c0_i32_0, %c0_i32_1 : i32, i32, i32
  }
  func.func @transform_3(%arg0: i32) -> (i32, i32, i32) {
    %c0_i32 = arith.constant 0 : i32
    %c0_i32_0 = arith.constant 0 : i32
    %c0_i32_1 = arith.constant 0 : i32
    %c0_i32_2 = arith.constant 0 : i32
    return %c0_i32, %c0_i32_0, %c0_i32_1 : i32, i32, i32
  }
  func.func @transform_4(%arg0: i32) -> (i32, i32) {
    %c0_i32 = arith.constant 0 : i32
    %c0_i32_0 = arith.constant 0 : i32
    return %arg0, %c0_i32 : i32, i32
  }
}

</mosaic_0001>

<bundles_post_ra>
// kernel: mlp_forward.1
= control target key start
LH: loop header
LB: loop body
LE: loop exit
PB: predicated region body
PF: predicated region fallthrough
CT: control target
= control target key end

     0   :  { %9 = vsyncpa [#allocation3], 0  ;;  %s1744_s15 = smov 0   ;;  %s1746_s16 = smov 0   ;;  %s2082_s0 = inlined_call_operand.vmem [shape: bf16[100,16], index: 0, kind: input, shape index: {}]   ;;  %s2083_s1 = inlined_call_operand.vmem [shape: bf16[16,128], index: 1, kind: input, shape index: {}]   ;;  %s2084_s2 = inlined_call_operand.hbm [shape: bf16[2,128,128], index: 2, kind: input, shape index: {}]   ;;  %s2085_s3 = inlined_call_operand.vmem [shape: f32[3,3,128], index: 3, kind: input, shape index: {}]   ;;  %s2086_s4 = inlined_call_operand.vmem [shape: f32[100,128], index: 4, kind: output, shape index: {}]  }
   0x1   :  { %s1748_s17 = smov 0  }
   0x2 LB: > { %s1757_s18 = sadd.s32 4294967295, %s1682_s17   ;;  %s1759_s19 = sadd.s32 1, %s1682_s17   ;;  %s1682_s17 = sphi %s1748_s17, %s2101_s17   ;;  %s1678_s16 = sphi %s1746_s16, %s2100_s16   ;;  %s1674_s15 = sphi %s1744_s15, %s2099_s15  }
   0x3   : > { %s108_s20 = ssub.s32 %s1682_s17, %s1759_s19  ;;  %s111_s21 = sadd.s32 1, %s1678_s16 }
   0x4   : > { %p109_p0 = scmp.eq.s32.totalorder %s108_s20, 0  ;;  %p121_p1 = scmp.ne.s32.totalorder %s1678_s16, %s1674_s15 }
   0x5   : > { %p122_p2 = scmp.eq.s32.totalorder %s1757_s18, 1  ;;  %p1284_p3 = scmp.ge.s32.totalorder %s1682_s17, 1 }
   0x6   : > { %s1767_s22 = scalar_select %p109_p0, %s1678_s16, %s111_s21  }
   0x7   : > { %p1769_p4 = por %p122_p2, %p121_p1  ;;  %p135_p5 = scmp.lt.s32.totalorder %s1682_s17, 3 }
   0x8   : > { %p2087_p6 = scmp.eq.s32.totalorder %s1757_s18, 0  ;;  %s1716_s25 = smov [#allocation2]  }
   0x9   : > { %s2089_s23 = scalar_select %p1769_p4, 1, 0 }
   0xa   : > { %p1774_p7 = pnand %p1284_p3, %p135_p5  ;;  %s150_s26 = sshll.u32 %s1716_s25, 4  ;;  %s151_s26 = int_to_ptr.vmem [resolvable:$true] %s150_s26 }
   0xb   : > { %s1596_s30 = scalar_lea.hbm %s2084_s2, 2048 }
   0xc   : > { %s2090_s24 = scalar_select %p1774_p7, 1, 0 }
   0xd   : > { %p1430_p8 = pneg %p1774_p7  ;;  %p1597_p10 = scmp.ne.s32.totalorder %s2084_s2, %s1596_s30 }
   0xe   : > { %p1603_p0 = scmp.lt.u32.totalorder %s1596_s30, %s2084_s2 }
   0xf   : > { %p1782_p9 = pnand %p2087_p6, %p1430_p8 }
  0x11   : > { %p1598_p11 = pneg %p1782_p9 }
  0x13   : > { %p1599_p12 = pnand %p1598_p11, %p1597_p10 }
  0x15   : > { %p1600_p13 = pneg %p1599_p12 }
  0x17   : > { %p1605_p1 = pnand %p1603_p0, %p1600_p13 }
  0x19   : > { %1608 = shalt.err (!%p1605_p1)
}
  0x1a   : > { %s1609_s9 = scalar_lea.vmem %s151_s26, 2048  ;;  %p1617_p8 = scmp.lt.s32.totalorder %s151_s26, %s151_s26 }
  0x1b   : > { %p1610_p2 = scmp.ne.s32.totalorder %s151_s26, %s1609_s9  ;;  %p1618_p6 = scmp.lt.s32.totalorder %s1609_s9, %s1609_s9 }
  0x1d   : > { %p1612_p3 = pnand %p1610_p2, %p1598_p11  ;;  %p1619_p4 = por %p1618_p6, %p1617_p8 }
  0x1f   : > { %p1613_p5 = pneg %p1612_p3 }
  0x21   : > { %p1620_p7 = pnand %p1619_p4, %p1613_p5 }
  0x23   : > { %1623 = shalt.err (!%p1620_p7)
}
  0x24   : > { %s1717_s10 = smov 64   ;;  %s1718_s11 = smov 4  }
  0x25   : > { %1433 = dma.hbm_to_vmem [thread:$0]  (!%p1782_p9), %s2084_s2, 2048, %s151_s26, [#allocation3], %s1717_s10, %s1717_s10, %s1718_s11  }
  0x26   : > { %p2092_p10 = scmp.ne.s32.totalorder %s2090_s24, 0 }
  0x27   : > { %p2093_p12 = scmp.eq.s32.totalorder (!%p2092_p10), %s1757_s18, 0 }
  0x28   : > { %186 = sbr.rel (%p2092_p10) target bundleno = 1726 (0x6be), region = 36 }
  0x2f   : > { %1669 = dma.done.wait (%p2093_p12), [#allocation3], 2048   ;;  %p2094_p11 = pmov %p2093_p12 }
  0x30   : > { %s1809_s14 = sshll.u32 %s1757_s18, 3  ;;  %v1527_v0 = vld [vmem:[%s2083_s1] sm:$0xff]   ;;  %vm276_vm0 = vcmask 130048   ;;  %v246_v5 = vlaneseq  ;;  %s212_s8 = sand.u32 1, %s1674_s15  }
  0x31   : > { %1671 = vsyncadd (%p2094_p11), [#allocation3], 4294965248  ;;  %p220_p4 = scmp.lt.s32.totalorder %s1809_s14, 12  ;;  %1368 = vmatprep.subr.bf16.mxu0 %v1527_v0  ;;  %v1827_v8 = vld [vmem:[%s2085_s3] sm:$0x7]  ;;  %s1289_s9 = sshll.u32 %s212_s8, 6 }
  0x32   : > { %1369 = vmatpush3.bf16.msra.mxu0 %v1527_v0  ;;  %v1819_v6 = vshrl.u32 %v246_v5, 7  ;;  %v1831_v26 = vand.u32 127, %v246_v5  ;;  %v1534_v5 = vld [vmem:[#allocation2 + $0x10] sm:$0xff]   ;;  %s2007_s15 = scalar_lea.vmem [#allocation4], %s1289_s9   ;;  %p2095_p6 = scmp.ne.s32.totalorder %s2089_s23, 0 }
  0x33   : > { %s221_s17 = scalar_select %p220_p4, %s1809_s14, 12 }
  0x34   : > { %v1822_v7 = vsub.s32 0, %v1819_v6  ;;  %vm388_vm1 = vcmp.lt.s32.totalorder %v1831_v26, 32  ;;  %s1036_s10 = ssub.s32 (%p2095_p6), 13, %s1809_s14  ;;  %s1336_s11 = sshll.u32 (%p2095_p6), %s1757_s18, 6 }
  0x35   : > { %s1291_s20 = sshll.u32 %s221_s17, 2  ;;  %p1037_p7 = scmp.lt.s32.totalorder (%p2095_p6), %s1036_s10, 8 }
  0x36   : > { %s223_s26 = scalar_lea.vmem %s2082_s0, %s1291_s20  ;;  %v249_v9 = vrot.slane %v1827_v8, %v1822_v7  ;;  %s2028_s17 = scalar_lea.vmem (%p2095_p6), %s2086_s4, %s1336_s11  }
  0x37   : > { %v1528_v1 = vld [vmem:[%s223_s26] sm:$0xff]   ;;  %v1529_v2 = vld [vmem:[%s223_s26 + $0x8] sm:$0xff]   ;;  %v1530_v3 = vld [vmem:[%s223_s26 + $0x10] sm:$0xff]  }
  0x38   : > { %1370 = vmatprep.mubr.msk.bf16.mxu0 %vm276_vm0, %v1528_v1  ;;  %v1531_v4 = vld [vmem:[%s223_s26 + $0x18] sm:$0xff]  }
  0x39   : > { %1371 = vmatmul.mubr.msk.bf16.vlgmr.msra.gmra.mrb[0].mxu0 %vm276_vm0, %v1529_v2  ;;  %v1532_v2 = vld [vmem:[#allocation2] sm:$0xff]  }
  0x3a   : > { %1374 = vmatprep.mubr.msk.bf16.mxu0 %vm276_vm0, %v1530_v3  ;;  %1378 = vmatprep.subr.bf16.mxu1 %v1532_v2 }
  0x3b   : > { %1379 = vmatpush3.bf16.msra.mxu1 %v1532_v2 }
  0x41   : > { %1375 = vmatmul.mubr.msk.bf16.gmra.mrb[4].mxu0 %vm276_vm0, %v1531_v4  ;;  %v1533_v4 = vld [vmem:[#allocation2 + $0x8] sm:$0xff]  }
  0x42   : > { %1380 = vmatprep.subr.bf16.mxu1 %v1533_v4 }
  0x43   : > { %1381 = vmatpush3.bf16.msra.mxu1 %v1533_v4 }
  0x44   : > { %1382 = vmatprep.subr.bf16.mxu1 %v1534_v5 }
  0x47   : > { %1383 = vmatpush3.bf16.msra.mxu1 %v1534_v5 }
 0x10c   : > { %v1372_v10 = vpop.f32.mrb[0].mxu0 }
 0x10d   : > { %v332_v11 = vadd.f32 %v1372_v10, %v249_v9  ;;  %v323_v12 = vpop.f32.mrb[1].mxu0  ;;  %v1536_v10 = vld [vmem:[#allocation2 + $0x20] sm:$0xff]  }
 0x10e   : > { %v324_v13 = vadd.f32 %v323_v12, %v249_v9  ;;  %v1373_v14 = vpop.f32.mrb[2].mxu0  ;;  %v1538_v12 = vld [vmem:[#allocation2 + $0x30] sm:$0xff]  }
 0x10f   : > { %358 = vadd.xlane.f32.xlu1 %v332_v11  ;;  %v326_v15 = vpop.f32.mrb[3].mxu0  ;;  %v335_v16 = vadd.f32 %v1373_v14, %v249_v9 }
 0x110   : > { %354 = vadd.xlane.f32.xlu0 %v324_v13  ;;  %v327_v17 = vadd.f32 %v326_v15, %v249_v9 }
 0x113   : > { %360 = vadd.xlane.f32.xlu1 %v335_v16 }
 0x114   : > { %v1376_v18 = vpop.f32.mrb[4].mxu0  ;;  %356 = vadd.xlane.f32.xlu0 %v327_v17 }
 0x115   : > { %v339_v19 = vpop.f32.mrb[5].mxu0  ;;  %v348_v24 = vadd.f32 %v1376_v18, %v249_v9 }
 0x116   : > { %v340_v20 = vadd.f32 %v339_v19, %v249_v9  ;;  %v1377_v21 = vpop.f32.mrb[6].mxu0 }
 0x117   : > { %v342_v22 = vpop.f32.mrb[7].mxu0  ;;  %v351_v25 = vadd.f32 %v1377_v21, %v249_v9 }
 0x118   : > { %v343_v23 = vadd.f32 %v342_v22, %v249_v9  ;;  %362 = vadd.xlane.f32.xlu0 %v340_v20  ;;  %v1535_v9 = vld [vmem:[#allocation2 + $0x18] sm:$0xff]  }
 0x119   : > { %1384 = vmatprep.subr.bf16.mxu1 %v1535_v9 }
 0x11a   : > { %364 = vadd.xlane.f32.xlu1 %v343_v23  ;;  %1385 = vmatpush3.bf16.msra.mxu1 %v1535_v9 }
 0x11b   : > { %1386 = vmatprep.subr.bf16.mxu1 %v1536_v10 }
 0x11c   : > { %366 = vadd.xlane.f32.xlu0 %v348_v24 }
 0x11e   : > { %368 = vadd.xlane.f32.xlu1 %v351_v25  ;;  %1387 = vmatpush3.bf16.msra.mxu1 %v1536_v10 }
 0x19c   : > { %v359_v27 = vpop.xlane.xlu1 %358 }
 0x19d   : > { %v372_v28 = vmul.f32 0.03125, %v359_v27  ;;  %v355_v29 = vpop.xlane.xlu0 %354 }
 0x19e   : > { %v370_v30 = vmul.f32 0.03125, %v355_v29 }
 0x19f   : > { %v1834_v31 = vsub.f32 %v332_v11, %v372_v28  ;;  %v1537_v11 = vld [vmem:[#allocation2 + $0x28] sm:$0xff]   ;;  %v1875_v28 = vsub.s32 1, %v1819_v6 }
 0x1a0   : > { %v1836_v32 = vsub.f32 %v324_v13, %v370_v30  ;;  %v361_v33 = vpop.xlane.xlu1 %360  ;;  %1388 = vmatprep.subr.bf16.mxu1 %v1537_v11  ;;  %v1539_v13 = vld [vmem:[#allocation2 + $0x38] sm:$0xff]  }
 0x1a1   : > { %v373_v34 = vmul.f32 0.03125, %v361_v33  ;;  %v357_v35 = vpop.xlane.xlu0 %356  ;;  %v391_v41 = vsel %vm388_vm1, %v1834_v31, 0.0  ;;  %1389 = vmatpush3.bf16.msra.mxu1 %v1537_v11 }
 0x1a2   : > { %v371_v36 = vmul.f32 0.03125, %v357_v35  ;;  %v389_v37 = vsel %vm388_vm1, %v1836_v32, 0.0  ;;  %v399_v46 = vmul.f32 %v391_v41, %v391_v41  ;;  %1390 = vmatprep.subr.bf16.mxu1 %v1538_v12 }
 0x1a3   : > { %v397_v38 = vmul.f32 %v389_v37, %v389_v37  ;;  %v1841_v39 = vsub.f32 %v335_v16, %v373_v34  ;;  %v456_v37 = vrot.slane %v1827_v8, %v1875_v28 }
 0x1a4   : > { %v1843_v40 = vsub.f32 %v327_v17, %v371_v36 }
 0x1a5   : > { %405 = vadd.xlane.f32.xlu0 %v397_v38  ;;  %v363_v42 = vpop.xlane.xlu0 %362  ;;  %v392_v50 = vsel %vm388_vm1, %v1841_v39, 0.0  ;;  %1391 = vmatpush3.bf16.msra.mxu1 %v1538_v12  ;;  %v1880_v38 = vsub.s32 2, %v1819_v6 }
 0x1a6   : > { %v374_v43 = vmul.f32 0.03125, %v363_v42  ;;  %v390_v44 = vsel %vm388_vm1, %v1843_v40, 0.0  ;;  %v400_v56 = vmul.f32 %v392_v50, %v392_v50  ;;  %1392 = vmatprep.subr.bf16.mxu1 %v1539_v13 }
 0x1a7   : > { %v365_v45 = vpop.xlane.xlu1 %364  ;;  %v398_v47 = vmul.f32 %v390_v44, %v390_v44 }
 0x1a8   : > { %v1851_v48 = vsub.f32 %v340_v20, %v374_v43  ;;  %v375_v49 = vmul.f32 0.03125, %v365_v45 }
 0x1a9   : > { %409 = vadd.xlane.f32.xlu0 %v399_v46  ;;  %407 = vadd.xlane.f32.xlu1 %v398_v47  ;;  %v367_v51 = vpop.xlane.xlu0 %366 }
 0x1aa   : > { %v1856_v52 = vsub.f32 %v343_v23, %v375_v49  ;;  %v376_v53 = vmul.f32 0.03125, %v367_v51  ;;  %v393_v54 = vsel %vm388_vm1, %v1851_v48, 0.0  ;;  %1393 = vmatpush3.bf16.msra.mxu1 %v1539_v13  ;;  %v468_v49 = vrot.slane %v1827_v8, %v1880_v38 }
 0x1ab   : > { %v369_v55 = vpop.xlane.xlu1 %368  ;;  %v401_v57 = vmul.f32 %v393_v54, %v393_v54 }
 0x1ac   : > { %v1861_v58 = vsub.f32 %v348_v24, %v376_v53  ;;  %v377_v59 = vmul.f32 0.03125, %v369_v55  ;;  %v394_v60 = vsel %vm388_vm1, %v1856_v52, 0.0 }
 0x1ad   : > { %411 = vadd.xlane.f32.xlu1 %v400_v56  ;;  %413 = vadd.xlane.f32.xlu0 %v401_v57  ;;  %v402_v63 = vmul.f32 %v394_v60, %v394_v60 }
 0x1ae   : > { %v1866_v61 = vsub.f32 %v351_v25, %v377_v59  ;;  %v395_v62 = vsel %vm388_vm1, %v1861_v58, 0.0 }
 0x1af   : > { %v403_v0 = vmul.f32 %v395_v62, %v395_v62 }
 0x1b0   : > { %v396_v1 = vsel %vm388_vm1, %v1866_v61, 0.0 }
 0x1b1   : > { %415 = vadd.xlane.f32.xlu1 %v402_v63  ;;  %417 = vadd.xlane.f32.xlu0 %v403_v0  ;;  %v404_v3 = vmul.f32 %v396_v1, %v396_v1 }
 0x1b5   : > { %419 = vadd.xlane.f32.xlu1 %v404_v3 }
 0x232   : > { %v406_v14 = vpop.xlane.xlu0 %405 }
 0x233   : > { %v421_v15 = vmul.f32 0.03125, %v406_v14 }
 0x235   : > { %v429_v16 = vadd.f32 1e-05, %v421_v15 }
 0x236   : > { %v408_v17 = vpop.xlane.xlu1 %407  ;;  %v410_v18 = vpop.xlane.xlu0 %409 }
 0x237   : > { %1548 = vrsqrt.f32 %v429_v16  ;;  %v422_v19 = vmul.f32 0.03125, %v408_v17  ;;  %v423_v20 = vmul.f32 0.03125, %v410_v18 }
 0x239   : > { %v430_v21 = vadd.f32 1e-05, %v422_v19  ;;  %v431_v22 = vadd.f32 1e-05, %v423_v20 }
 0x23a   : > { %v412_v23 = vpop.xlane.xlu1 %411  ;;  %v414_v24 = vpop.xlane.xlu0 %413 }
 0x23b   : > { %1550 = vrsqrt.f32 %v430_v21  ;;  %v424_v25 = vmul.f32 0.03125, %v412_v23  ;;  %v425_v27 = vmul.f32 0.03125, %v414_v24 }
 0x23c   : > { %1552 = vrsqrt.f32 %v431_v22 }
 0x23d   : > { %v432_v29 = vadd.f32 1e-05, %v424_v25  ;;  %v433_v30 = vadd.f32 1e-05, %v425_v27  ;;  %v1895_v25 = vld [vmem:[%s2085_s3 + $0x4] sm:$0x7] }
 0x23e   : > { %v416_v33 = vpop.xlane.xlu1 %415  ;;  %v418_v34 = vpop.xlane.xlu0 %417 }
 0x23f   : > { %1554 = vrsqrt.f32 %v432_v29  ;;  %v426_v35 = vmul.f32 0.03125, %v416_v33  ;;  %v427_v36 = vmul.f32 0.03125, %v418_v34 }
 0x240   : > { %1556 = vrsqrt.f32 %v433_v30 }
 0x241   : > { %v1549_v41 = vpop.eup %1548  ;;  %v434_v42 = vadd.f32 1e-05, %v426_v35  ;;  %v435_v43 = vadd.f32 1e-05, %v427_v36 }
 0x242   : > { %v420_v44 = vpop.xlane.xlu1 %419  ;;  %v445_v45 = vmul.f32 %v1549_v41, %v1836_v32 }
 0x243   : > { %1558 = vrsqrt.f32 %v434_v42  ;;  %v428_v46 = vmul.f32 0.03125, %v420_v44 }
 0x244   : > { %1560 = vrsqrt.f32 %v435_v43  ;;  %v457_v47 = vmul.f32 %v456_v37, %v445_v45 }
 0x245   : > { %v1551_v50 = vpop.eup %1550  ;;  %v436_v51 = vadd.f32 1e-05, %v428_v46 }
 0x246   : > { %v1553_v53 = vpop.eup %1552  ;;  %v446_v54 = vmul.f32 %v1551_v50, %v1843_v40  ;;  %v469_v56 = vadd.f32 %v468_v49, %v457_v47  ;;  %v1540_v50 = vld [vmem:[#allocation2 + $0x40] sm:$0xff]  }
 0x247   : > { %1562 = vrsqrt.f32 %v436_v51  ;;  %v447_v6 = vmul.f32 %v1553_v53, %v1834_v31  ;;  %1402 = vmatprep.subr.bf16.mxu0 %v1540_v50 }
 0x248   : > { %v458_v55 = vmul.f32 %v456_v37, %v446_v54  ;;  %v477_v0 = vmax.f32 %v469_v56, 0.0  ;;  %1403 = vmatpush3.bf16.msra.mxu0 %v1540_v50 }
 0x249   : > { %v1555_v57 = vpop.eup %1554  ;;  %v459_v59 = vmul.f32 %v456_v37, %v447_v6 }
 0x24a   : > { %v1557_v32 = vpop.eup %1556  ;;  %v470_v60 = vadd.f32 %v468_v49, %v458_v55  ;;  %v448_v62 = vmul.f32 %v1555_v57, %v1841_v39 }
 0x24b   : > { %v449_v63 = vmul.f32 %v1557_v32, %v1851_v48  ;;  %v471_v2 = vadd.f32 %v468_v49, %v459_v59 }
 0x24c   : > { %v478_v8 = vmax.f32 %v470_v60, 0.0  ;;  %v460_v1 = vmul.f32 %v456_v37, %v448_v62 }
 0x24d   : > { %v1559_v3 = vpop.eup %1558  ;;  %v461_v4 = vmul.f32 %v456_v37, %v449_v63  ;;  %v479_v11 = vmax.f32 %v471_v2, 0.0 }
 0x24e   : > { %v1561_v40 = vpop.eup %1560  ;;  %v503_v5 = vpack.c.bf16 %v478_v8, %v477_v0  ;;  %v472_v9 = vadd.f32 %v468_v49, %v460_v1  ;;  %v450_v31 = vmul.f32 %v1559_v3, %v1856_v52 }
 0x24f   : > { %v451_v10 = vmul.f32 %v1561_v40, %v1861_v58  ;;  %v473_v39 = vadd.f32 %v468_v49, %v461_v4 }
 0x250   : > { %1394 = vmatprep.mubr.bf16.mxu1 %v503_v5  ;;  %v480_v12 = vmax.f32 %v472_v9, 0.0  ;;  %v462_v13 = vmul.f32 %v456_v37, %v450_v31 }
 0x251   : > { %v1563_v14 = vpop.eup %1562  ;;  %v463_v48 = vmul.f32 %v456_v37, %v451_v10  ;;  %v481_v18 = vmax.f32 %v473_v39, 0.0 }
 0x252   : > { %v504_v15 = vpack.c.bf16 %v480_v12, %v479_v11  ;;  %v474_v16 = vadd.f32 %v468_v49, %v462_v13  ;;  %v452_v17 = vmul.f32 %v1563_v14, %v1866_v61  ;;  %v510_v61 = vrot.slane %v1895_v25, %v1822_v7 }
 0x253   : > { %v475_v21 = vadd.f32 %v468_v49, %v463_v48 }
 0x254   : > { %1395 = vmatmul.mubr.bf16.vlgmr.msra.gmra.mrb[0].mxu1 %v504_v15  ;;  %v482_v19 = vmax.f32 %v474_v16, 0.0  ;;  %v464_v20 = vmul.f32 %v456_v37, %v452_v17 }
 0x255   : > { %v483_v58 = vmax.f32 %v475_v21, 0.0 }
 0x256   : > { %v505_v22 = vpack.c.bf16 %v482_v19, %v481_v18  ;;  %v476_v52 = vadd.f32 %v468_v49, %v464_v20 }
 0x258   : > { %1398 = vmatprep.mubr.bf16.mxu1 %v505_v22  ;;  %v484_v23 = vmax.f32 %v476_v52, 0.0 }
 0x25a   : > { %v506_v24 = vpack.c.bf16 %v484_v23, %v483_v58 }
 0x25c   : > { %1399 = vmatmul.mubr.bf16.gmra.mrb[4].mxu1 %v506_v24  ;;  %v1541_v24 = vld [vmem:[#allocation2 + $0x48] sm:$0xff]  }
 0x25d   : > { %1404 = vmatprep.subr.bf16.mxu0 %v1541_v24 }
 0x25e   : > { %1405 = vmatpush3.bf16.msra.mxu0 %v1541_v24 }
 0x327   : > { %v1396_v27 = vpop.f32.mrb[0].mxu1 }
 0x328   : > { %v593_v29 = vpop.f32.mrb[1].mxu1  ;;  %v602_v36 = vadd.f32 %v1396_v27, %v510_v61  ;;  %v1543_v27 = vld [vmem:[#allocation2 + $0x58] sm:$0xff]  }
 0x329   : > { %v594_v30 = vadd.f32 %v593_v29, %v510_v61  ;;  %v1397_v33 = vpop.f32.mrb[2].mxu1  ;;  %v1544_v29 = vld [vmem:[#allocation2 + $0x60] sm:$0xff]  }
 0x32a   : > { %v596_v34 = vpop.f32.mrb[3].mxu1  ;;  %v605_v37 = vadd.f32 %v1397_v33, %v510_v61  ;;  %v1546_v33 = vld [vmem:[#allocation2 + $0x70] sm:$0xff]  }
 0x32b   : > { %v597_v35 = vadd.f32 %v596_v34, %v510_v61  ;;  %624 = vadd.xlane.f32.xlu0 %v594_v30  ;;  %v1547_v34 = vld [vmem:[#allocation2 + $0x78] sm:$0xff]  }
 0x32d   : > { %626 = vadd.xlane.f32.xlu1 %v597_v35 }
 0x32f   : > { %628 = vadd.xlane.f32.xlu0 %v602_v36  ;;  %v1400_v41 = vpop.f32.mrb[4].mxu1 }
 0x330   : > { %v609_v42 = vpop.f32.mrb[5].mxu1  ;;  %v618_v47 = vadd.f32 %v1400_v41, %v510_v61 }
 0x331   : > { %v610_v43 = vadd.f32 %v609_v42, %v510_v61  ;;  %630 = vadd.xlane.f32.xlu1 %v605_v37  ;;  %v1401_v44 = vpop.f32.mrb[6].mxu1 }
 0x332   : > { %v612_v45 = vpop.f32.mrb[7].mxu1  ;;  %v621_v49 = vadd.f32 %v1401_v44, %v510_v61 }
 0x333   : > { %v613_v46 = vadd.f32 %v612_v45, %v510_v61  ;;  %632 = vadd.xlane.f32.xlu0 %v610_v43  ;;  %v1542_v61 = vld [vmem:[#allocation2 + $0x50] sm:$0xff]  }
 0x334   : > { %1406 = vmatprep.subr.bf16.mxu0 %v1542_v61 }
 0x335   : > { %634 = vadd.xlane.f32.xlu1 %v613_v46  ;;  %1407 = vmatpush3.bf16.msra.mxu0 %v1542_v61 }
 0x336   : > { %1408 = vmatprep.subr.bf16.mxu0 %v1543_v27 }
 0x337   : > { %636 = vadd.xlane.f32.xlu0 %v618_v47 }
 0x339   : > { %638 = vadd.xlane.f32.xlu1 %v621_v49  ;;  %1409 = vmatpush3.bf16.msra.mxu0 %v1543_v27 }
 0x33a   : > { %1410 = vmatprep.subr.bf16.mxu0 %v1544_v29 }
 0x33d   : > { %1411 = vmatpush3.bf16.msra.mxu0 %v1544_v29 }
 0x3b8   : > { %v625_v51 = vpop.xlane.xlu0 %624 }
 0x3b9   : > { %v640_v53 = vmul.f32 0.03125, %v625_v51 }
 0x3ba   : > { %v627_v54 = vpop.xlane.xlu1 %626 }
 0x3bb   : > { %v1899_v6 = vsub.f32 %v594_v30, %v640_v53  ;;  %v641_v55 = vmul.f32 0.03125, %v627_v54  ;;  %v1545_v30 = vld [vmem:[#allocation2 + $0x68] sm:$0xff]  }
 0x3bc   : > { %v629_v56 = vpop.xlane.xlu0 %628  ;;  %1412 = vmatprep.subr.bf16.mxu0 %v1545_v30 }
 0x3bd   : > { %v1901_v57 = vsub.f32 %v597_v35, %v641_v55  ;;  %v642_v59 = vmul.f32 0.03125, %v629_v56  ;;  %v656_v32 = vsel %vm388_vm1, %v1899_v6, 0.0  ;;  %1413 = vmatpush3.bf16.msra.mxu0 %v1545_v30 }
 0x3be   : > { %v631_v60 = vpop.xlane.xlu1 %630  ;;  %v664_v62 = vmul.f32 %v656_v32, %v656_v32  ;;  %1414 = vmatprep.subr.bf16.mxu0 %v1546_v33 }
 0x3bf   : > { %v1906_v63 = vsub.f32 %v602_v36, %v642_v59  ;;  %v643_v0 = vmul.f32 0.03125, %v631_v60  ;;  %v657_v8 = vsel %vm388_vm1, %v1901_v57, 0.0 }
 0x3c0   : > { %672 = vadd.xlane.f32.xlu0 %v664_v62  ;;  %v633_v1 = vpop.xlane.xlu0 %632  ;;  %v665_v2 = vmul.f32 %v657_v8, %v657_v8  ;;  %v723_v62 = vrot.slane %v1895_v25, %v1875_v28 }
 0x3c1   : > { %v1911_v3 = vsub.f32 %v605_v37, %v643_v0  ;;  %v644_v4 = vmul.f32 0.03125, %v633_v1  ;;  %v658_v40 = vsel %vm388_vm1, %v1906_v63, 0.0  ;;  %1415 = vmatpush3.bf16.msra.mxu0 %v1546_v33 }
 0x3c2   : > { %674 = vadd.xlane.f32.xlu1 %v665_v2  ;;  %v635_v5 = vpop.xlane.xlu1 %634  ;;  %v666_v9 = vmul.f32 %v658_v40, %v658_v40  ;;  %1416 = vmatprep.subr.bf16.mxu0 %v1547_v34 }
 0x3c3   : > { %v1916_v31 = vsub.f32 %v610_v43, %v644_v4  ;;  %v645_v10 = vmul.f32 0.03125, %v635_v5  ;;  %v659_v11 = vsel %vm388_vm1, %v1911_v3, 0.0  ;;  %v735_v4 = vrot.slane %v1895_v25, %v1880_v38 }
 0x3c4   : > { %676 = vadd.xlane.f32.xlu0 %v666_v9  ;;  %v637_v12 = vpop.xlane.xlu0 %636  ;;  %v667_v13 = vmul.f32 %v659_v11, %v659_v11 }
 0x3c5   : > { %v1921_v39 = vsub.f32 %v613_v46, %v645_v10  ;;  %v646_v14 = vmul.f32 0.03125, %v637_v12  ;;  %v660_v48 = vsel %vm388_vm1, %v1916_v31, 0.0  ;;  %1417 = vmatpush3.bf16.msra.mxu0 %v1547_v34 }
 0x3c6   : > { %678 = vadd.xlane.f32.xlu1 %v667_v13  ;;  %v639_v15 = vpop.xlane.xlu1 %638  ;;  %v668_v16 = vmul.f32 %v660_v48, %v660_v48 }
 0x3c7   : > { %v1926_v17 = vsub.f32 %v618_v47, %v646_v14  ;;  %v647_v18 = vmul.f32 0.03125, %v639_v15  ;;  %v661_v19 = vsel %vm388_vm1, %v1921_v39, 0.0 }
 0x3c8   : > { %680 = vadd.xlane.f32.xlu0 %v668_v16  ;;  %v669_v20 = vmul.f32 %v661_v19, %v661_v19 }
 0x3c9   : > { %v1931_v21 = vsub.f32 %v621_v49, %v647_v18  ;;  %v662_v22 = vsel %vm388_vm1, %v1926_v17, 0.0 }
 0x3ca   : > { %682 = vadd.xlane.f32.xlu1 %v669_v20  ;;  %v670_v52 = vmul.f32 %v662_v22, %v662_v22 }
 0x3cb   : > { %v663_v58 = vsel %vm388_vm1, %v1931_v21, 0.0 }
 0x3cc   : > { %684 = vadd.xlane.f32.xlu0 %v670_v52  ;;  %v671_v23 = vmul.f32 %v663_v58, %v663_v58 }
 0x3ce   : > { %686 = vadd.xlane.f32.xlu1 %v671_v23 }
 0x44d   : > { %v673_v35 = vpop.xlane.xlu0 %672 }
 0x44e   : > { %v688_v36 = vmul.f32 0.03125, %v673_v35 }
 0x44f   : > { %v675_v37 = vpop.xlane.xlu1 %674 }
 0x450   : > { %v696_v41 = vadd.f32 1e-05, %v688_v36  ;;  %v689_v42 = vmul.f32 0.03125, %v675_v37 }
 0x451   : > { %v677_v43 = vpop.xlane.xlu0 %676 }
 0x452   : > { %1564 = vrsqrt.f32 %v696_v41  ;;  %v697_v44 = vadd.f32 1e-05, %v689_v42  ;;  %v690_v45 = vmul.f32 0.03125, %v677_v43 }
 0x453   : > { %v679_v46 = vpop.xlane.xlu1 %678 }
 0x454   : > { %1566 = vrsqrt.f32 %v697_v44  ;;  %v698_v47 = vadd.f32 1e-05, %v690_v45  ;;  %v691_v49 = vmul.f32 0.03125, %v679_v46 }
 0x455   : > { %v681_v50 = vpop.xlane.xlu0 %680 }
 0x456   : > { %1568 = vrsqrt.f32 %v698_v47  ;;  %v699_v51 = vadd.f32 1e-05, %v691_v49  ;;  %v692_v53 = vmul.f32 0.03125, %v681_v50 }
 0x457   : > { %v683_v54 = vpop.xlane.xlu1 %682 }
 0x458   : > { %1570 = vrsqrt.f32 %v699_v51  ;;  %v700_v55 = vadd.f32 1e-05, %v692_v53  ;;  %v693_v56 = vmul.f32 0.03125, %v683_v54 }
 0x459   : > { %v685_v59 = vpop.xlane.xlu0 %684 }
 0x45a   : > { %1572 = vrsqrt.f32 %v700_v55  ;;  %v701_v32 = vadd.f32 1e-05, %v693_v56  ;;  %v694_v60 = vmul.f32 0.03125, %v685_v59 }
 0x45b   : > { %v687_v0 = vpop.xlane.xlu1 %686 }
 0x45c   : > { %v1565_v8 = vpop.eup %1564  ;;  %1574 = vrsqrt.f32 %v701_v32  ;;  %v702_v1 = vadd.f32 1e-05, %v694_v60  ;;  %v695_v2 = vmul.f32 0.03125, %v687_v0 }
 0x45d   : > { %v712_v40 = vmul.f32 %v1565_v8, %v1899_v6 }
 0x45e   : > { %v1567_v5 = vpop.eup %1566  ;;  %1576 = vrsqrt.f32 %v702_v1  ;;  %v703_v9 = vadd.f32 1e-05, %v695_v2 }
 0x45f   : > { %v713_v10 = vmul.f32 %v1567_v5, %v1901_v57  ;;  %v724_v11 = vmul.f32 %v723_v62, %v712_v40 }
 0x460   : > { %v1569_v12 = vpop.eup %1568  ;;  %1578 = vrsqrt.f32 %v703_v9 }
 0x461   : > { %v714_v13 = vmul.f32 %v1569_v12, %v1906_v63  ;;  %v725_v14 = vmul.f32 %v723_v62, %v713_v10  ;;  %v736_v48 = vadd.f32 %v735_v4, %v724_v11 }
 0x462   : > { %v1571_v15 = vpop.eup %1570 }
 0x463   : > { %v726_v16 = vmul.f32 %v723_v62, %v714_v13  ;;  %v715_v18 = vmul.f32 %v1571_v15, %v1911_v3  ;;  %v737_v19 = vadd.f32 %v735_v4, %v725_v14  ;;  %v744_v20 = vmax.f32 %v736_v48, 0.0 }
 0x464   : > { %v1573_v25 = vpop.eup %1572 }
 0x465   : > { %v727_v6 = vmul.f32 %v723_v62, %v715_v18  ;;  %v745_v22 = vmax.f32 %v737_v19, 0.0  ;;  %v738_v52 = vadd.f32 %v735_v4, %v726_v16  ;;  %v716_v58 = vmul.f32 %v1573_v25, %v1916_v31 }
 0x466   : > { %v1575_v57 = vpop.eup %1574 }
 0x467   : > { %v771_v23 = vpack.c.bf16 %v745_v22, %v744_v20  ;;  %v739_v24 = vadd.f32 %v735_v4, %v727_v6  ;;  %v717_v61 = vmul.f32 %v1575_v57, %v1921_v39  ;;  %v728_v27 = vmul.f32 %v723_v62, %v716_v58 }
 0x468   : > { %v1577_v63 = vpop.eup %1576  ;;  %v746_v29 = vmax.f32 %v738_v52, 0.0 }
 0x469   : > { %1418 = vmatprep.mubr.bf16.mxu0 %v771_v23  ;;  %v747_v30 = vmax.f32 %v739_v24, 0.0  ;;  %v729_v33 = vmul.f32 %v723_v62, %v717_v61  ;;  %v718_v3 = vmul.f32 %v1577_v63, %v1926_v17  ;;  %v740_v35 = vadd.f32 %v735_v4, %v728_v27  ;;  %v1954_v17 = vld [vmem:[%s2085_s3 + $0x8] sm:$0x7] }
 0x46a   : > { %v1579_v34 = vpop.eup %1578 }
 0x46b   : > { %v772_v36 = vpack.c.bf16 %v747_v30, %v746_v29  ;;  %v741_v37 = vadd.f32 %v735_v4, %v729_v33  ;;  %v719_v41 = vmul.f32 %v1579_v34, %v1931_v21  ;;  %v730_v31 = vmul.f32 %v723_v62, %v718_v3 }
 0x46c   : > { %v748_v42 = vmax.f32 %v740_v35, 0.0  ;;  %v778_v21 = vrot.slane %v1954_v17, %v1822_v7 }
 0x46d   : > { %1419 = vmatmul.mubr.bf16.vlgmr.msra.gmra.mrb[8].mxu0 %v772_v36  ;;  %v749_v43 = vmax.f32 %v741_v37, 0.0  ;;  %v731_v44 = vmul.f32 %v723_v62, %v719_v41  ;;  %v742_v39 = vadd.f32 %v735_v4, %v730_v31 }
 0x46f   : > { %v773_v45 = vpack.c.bf16 %v749_v43, %v748_v42  ;;  %v743_v46 = vadd.f32 %v735_v4, %v731_v44  ;;  %v750_v47 = vmax.f32 %v742_v39, 0.0 }
 0x471   : > { %1422 = vmatprep.mubr.bf16.mxu0 %v773_v45  ;;  %v751_v49 = vmax.f32 %v743_v46, 0.0 }
 0x473   : > { %v774_v50 = vpack.c.bf16 %v751_v49, %v750_v47 }
 0x475   : > { %1423 = vmatmul.mubr.bf16.gmra.mrb[12].mxu0 %v774_v50 }
 0x540   : > { %v1420_v51 = vpop.f32.mrb[8].mxu0 }
 0x541   : > { %v870_v53 = vadd.f32 %v1420_v51, %v778_v21  ;;  %v861_v54 = vpop.f32.mrb[9].mxu0 }
 0x542   : > { %v1421_v55 = vpop.f32.mrb[10].mxu0  ;;  %v862_v32 = vadd.f32 %v861_v54, %v778_v21 }
 0x543   : > { %v873_v56 = vadd.f32 %v1421_v55, %v778_v21  ;;  %896 = vadd.xlane.f32.xlu0 %v870_v53  ;;  %v864_v59 = vpop.f32.mrb[11].mxu0 }
 0x544   : > { %v865_v60 = vadd.f32 %v864_v59, %v778_v21 }
 0x545   : > { %898 = vadd.xlane.f32.xlu1 %v873_v56 }
 0x547   : > { %892 = vadd.xlane.f32.xlu0 %v862_v32 }
 0x548   : > { %v1424_v62 = vpop.f32.mrb[12].mxu0 }
 0x549   : > { %894 = vadd.xlane.f32.xlu1 %v865_v60  ;;  %v877_v0 = vpop.f32.mrb[13].mxu0  ;;  %v886_v7 = vadd.f32 %v1424_v62, %v778_v21 }
 0x54a   : > { %v878_v8 = vadd.f32 %v877_v0, %v778_v21  ;;  %v1425_v1 = vpop.f32.mrb[14].mxu0 }
 0x54b   : > { %v880_v2 = vpop.f32.mrb[15].mxu0  ;;  %v889_v40 = vadd.f32 %v1425_v1, %v778_v21 }
 0x54c   : > { %v881_v4 = vadd.f32 %v880_v2, %v778_v21  ;;  %900 = vadd.xlane.f32.xlu0 %v878_v8 }
 0x54e   : > { %902 = vadd.xlane.f32.xlu1 %v881_v4 }
 0x550   : > { %904 = vadd.xlane.f32.xlu0 %v886_v7 }
 0x552   : > { %906 = vadd.xlane.f32.xlu1 %v889_v40 }
 0x5d0   : > { %v897_v5 = vpop.xlane.xlu0 %896 }
 0x5d1   : > { %v910_v9 = vmul.f32 0.03125, %v897_v5 }
 0x5d2   : > { %v899_v10 = vpop.xlane.xlu1 %898 }
 0x5d3   : > { %v1958_v11 = vsub.f32 %v870_v53, %v910_v9  ;;  %v911_v12 = vmul.f32 0.03125, %v899_v10  ;;  %v1003_v9 = vrot.slane %v1954_v17, %v1880_v38 }
 0x5d4   : > { %v893_v13 = vpop.xlane.xlu0 %892 }
 0x5d5   : > { %v1960_v14 = vsub.f32 %v873_v56, %v911_v12  ;;  %v908_v48 = vmul.f32 0.03125, %v893_v13  ;;  %v926_v15 = vsel %vm388_vm1, %v1958_v11, 0.0 }
 0x5d6   : > { %v895_v16 = vpop.xlane.xlu1 %894  ;;  %v934_v18 = vmul.f32 %v926_v15, %v926_v15 }
 0x5d7   : > { %v1965_v19 = vsub.f32 %v862_v32, %v908_v48  ;;  %v909_v25 = vmul.f32 0.03125, %v895_v16  ;;  %v927_v20 = vsel %vm388_vm1, %v1960_v14, 0.0 }
 0x5d8   : > { %944 = vadd.xlane.f32.xlu0 %v934_v18  ;;  %v935_v6 = vmul.f32 %v927_v20, %v927_v20 }
 0x5d9   : > { %v1970_v22 = vsub.f32 %v865_v60, %v909_v25  ;;  %v901_v52 = vpop.xlane.xlu0 %900  ;;  %v924_v58 = vsel %vm388_vm1, %v1965_v19, 0.0 }
 0x5da   : > { %v912_v57 = vmul.f32 0.03125, %v901_v52  ;;  %946 = vadd.xlane.f32.xlu1 %v935_v6  ;;  %v932_v23 = vmul.f32 %v924_v58, %v924_v58 }
 0x5db   : > { %v903_v24 = vpop.xlane.xlu1 %902  ;;  %v925_v61 = vsel %vm388_vm1, %v1970_v22, 0.0 }
 0x5dc   : > { %v1978_v63 = vsub.f32 %v878_v8, %v912_v57  ;;  %v913_v27 = vmul.f32 0.03125, %v903_v24  ;;  %940 = vadd.xlane.f32.xlu0 %v932_v23  ;;  %v933_v29 = vmul.f32 %v925_v61, %v925_v61 }
 0x5dd   : > { %v905_v30 = vpop.xlane.xlu0 %904 }
 0x5de   : > { %v1980_v33 = vsub.f32 %v881_v4, %v913_v27  ;;  %v914_v3 = vmul.f32 0.03125, %v905_v30  ;;  %942 = vadd.xlane.f32.xlu1 %v933_v29  ;;  %v928_v34 = vsel %vm388_vm1, %v1978_v63, 0.0  ;;  %v991_v4 = vrot.slane %v1954_v17, %v1875_v28 }
 0x5df   : > { %v907_v35 = vpop.xlane.xlu1 %906  ;;  %v936_v36 = vmul.f32 %v928_v34, %v928_v34 }
 0x5e0   : > { %v1985_v37 = vsub.f32 %v886_v7, %v914_v3  ;;  %v915_v41 = vmul.f32 0.03125, %v907_v35  ;;  %v929_v31 = vsel %vm388_vm1, %v1980_v33, 0.0 }
 0x5e1   : > { %948 = vadd.xlane.f32.xlu0 %v936_v36  ;;  %v937_v42 = vmul.f32 %v929_v31, %v929_v31 }
 0x5e2   : > { %v1990_v43 = vsub.f32 %v889_v40, %v915_v41  ;;  %v930_v44 = vsel %vm388_vm1, %v1985_v37, 0.0 }
 0x5e3   : > { %950 = vadd.xlane.f32.xlu1 %v937_v42  ;;  %v938_v39 = vmul.f32 %v930_v44, %v930_v44 }
 0x5e4   : > { %v931_v45 = vsel %vm388_vm1, %v1990_v43, 0.0 }
 0x5e5   : > { %952 = vadd.xlane.f32.xlu0 %v938_v39  ;;  %v939_v46 = vmul.f32 %v931_v45, %v931_v45 }
 0x5e7   : > { %954 = vadd.xlane.f32.xlu1 %v939_v46 }
 0x665   : > { %v945_v47 = vpop.xlane.xlu0 %944 }
 0x666   : > { %v958_v49 = vmul.f32 0.03125, %v945_v47 }
 0x667   : > { %v947_v50 = vpop.xlane.xlu1 %946 }
 0x668   : > { %v966_v21 = vadd.f32 1e-05, %v958_v49  ;;  %v959_v51 = vmul.f32 0.03125, %v947_v50 }
 0x669   : > { %v941_v53 = vpop.xlane.xlu0 %940 }
 0x66a   : > { %1580 = vrsqrt.f32 %v966_v21  ;;  %v967_v54 = vadd.f32 1e-05, %v959_v51  ;;  %v956_v55 = vmul.f32 0.03125, %v941_v53 }
 0x66b   : > { %v943_v56 = vpop.xlane.xlu1 %942 }
 0x66c   : > { %1582 = vrsqrt.f32 %v967_v54  ;;  %v964_v59 = vadd.f32 1e-05, %v956_v55  ;;  %v957_v32 = vmul.f32 0.03125, %v943_v56 }
 0x66e   : > { %1584 = vrsqrt.f32 %v964_v59  ;;  %v965_v26 = vadd.f32 1e-05, %v957_v32  ;;  %v949_v60 = vpop.xlane.xlu0 %948 }
 0x66f   : > { %v960_v62 = vmul.f32 0.03125, %v949_v60 }
 0x670   : > { %1586 = vrsqrt.f32 %v965_v26  ;;  %v951_v0 = vpop.xlane.xlu1 %950 }
 0x671   : > { %v968_v8 = vadd.f32 1e-05, %v960_v62  ;;  %v961_v1 = vmul.f32 0.03125, %v951_v0 }
 0x672   : > { %v953_v2 = vpop.xlane.xlu0 %952 }
 0x673   : > { %1588 = vrsqrt.f32 %v968_v8  ;;  %v969_v7 = vadd.f32 1e-05, %v961_v1  ;;  %v962_v40 = vmul.f32 0.03125, %v953_v2 }
 0x674   : > { %v1581_v5 = vpop.eup %1580  ;;  %v955_v10 = vpop.xlane.xlu1 %954 }
 0x675   : > { %v982_v12 = vmul.f32 %v1581_v5, %v1958_v11  ;;  %1590 = vrsqrt.f32 %v969_v7  ;;  %v970_v13 = vadd.f32 1e-05, %v962_v40  ;;  %v963_v48 = vmul.f32 0.03125, %v955_v10 }
 0x676   : > { %v1583_v15 = vpop.eup %1582 }
 0x677   : > { %v994_v16 = vmul.f32 %v991_v4, %v982_v12  ;;  %v983_v18 = vmul.f32 %v1583_v15, %v1960_v14  ;;  %1592 = vrsqrt.f32 %v970_v13  ;;  %v971_v28 = vadd.f32 1e-05, %v963_v48 }
 0x678   : > { %v1585_v25 = vpop.eup %1584 }
 0x679   : > { %v1006_v20 = vadd.f32 %v1003_v9, %v994_v16  ;;  %v995_v6 = vmul.f32 %v991_v4, %v983_v18  ;;  %v980_v52 = vmul.f32 %v1585_v25, %v1965_v19  ;;  %1594 = vrsqrt.f32 %v971_v28 }
 0x67a   : > { %v1587_v38 = vpop.eup %1586 }
 0x67b   : > { %v1014_v17 = vmax.f32 %v1006_v20, 0.0  ;;  %v1007_v58 = vadd.f32 %v1003_v9, %v995_v6  ;;  %v992_v11 = vmul.f32 %v991_v4, %v980_v52  ;;  %v981_v57 = vmul.f32 %v1587_v38, %v1970_v22 }
 0x67d   : > { %v1589_v23 = vpop.eup %1588  ;;  %1022 = vst [vmem:[%s2007_s15 + $0x10] sm:$0xff] %v1014_v17  ;;  %v1015_v14 = vmax.f32 %v1007_v58, 0.0  ;;  %v1004_v24 = vadd.f32 %v1003_v9, %v992_v11  ;;  %v993_v61 = vmul.f32 %v991_v4, %v981_v57 }
 0x67e   : > { %v984_v19 = vmul.f32 %v1589_v23, %v1978_v63 }
 0x67f   : > { %v1591_v27 = vpop.eup %1590  ;;  %1023 = vst [vmem:[%s2007_s15 + $0x18] sm:$0xff] %v1015_v14  ;;  %v1012_v29 = vmax.f32 %v1004_v24, 0.0  ;;  %v1005_v30 = vadd.f32 %v1003_v9, %v993_v61 }
 0x680   : > { %v996_v3 = vmul.f32 %v991_v4, %v984_v19  ;;  %v985_v22 = vmul.f32 %v1591_v27, %v1980_v33 }
 0x681   : > { %v1593_v34 = vpop.eup %1592  ;;  %1020 = vst [vmem:[%s2007_s15] sm:$0xff] %v1012_v29  ;;  %v1013_v35 = vmax.f32 %v1005_v30, 0.0 }
 0x682   : > { %v1008_v36 = vadd.f32 %v1003_v9, %v996_v3  ;;  %v997_v41 = vmul.f32 %v991_v4, %v985_v22  ;;  %v986_v31 = vmul.f32 %v1593_v34, %v1985_v37 }
 0x683   : > { %v1595_v42 = vpop.eup %1594  ;;  %1021 = vst [vmem:[%s2007_s15 + $0x8] sm:$0xff] %v1013_v35 }
 0x684   : > { %v1016_v63 = vmax.f32 %v1008_v36, 0.0  ;;  %v1009_v44 = vadd.f32 %v1003_v9, %v997_v41  ;;  %v998_v39 = vmul.f32 %v991_v4, %v986_v31  ;;  %v987_v45 = vmul.f32 %v1595_v42, %v1990_v43 }
 0x686   : > { %1024 = vst [vmem:[%s2007_s15 + $0x20] sm:$0xff] %v1016_v63  ;;  %v1017_v46 = vmax.f32 %v1009_v44, 0.0  ;;  %v1010_v33 = vadd.f32 %v1003_v9, %v998_v39  ;;  %v999_v47 = vmul.f32 %v991_v4, %v987_v45  ;;  %1034 = sbr.rel (!%p2095_p6) target bundleno = 1726 (0x6be), region = 44 }
 0x688   : > { %1025 = vst [vmem:[%s2007_s15 + $0x28] sm:$0xff] %v1017_v46  ;;  %v1018_v49 = vmax.f32 %v1010_v33, 0.0  ;;  %v1011_v50 = vadd.f32 %v1003_v9, %v999_v47 }
 0x68a   : > { %1026 = vst [vmem:[%s2007_s15 + $0x30] sm:$0xff] %v1018_v49  ;;  %v1019_v21 = vmax.f32 %v1011_v50, 0.0 }
 0x68c   : > { %1027 = vst [vmem:[%s2007_s15 + $0x38] sm:$0xff] %v1019_v21 }
 0x68d   : > { %s2103_s10 = smov (!%p1037_p7, %s1036_s10), 8 }
 0x68e   : > { %s1321_s20 = sshll.u32 %s2103_s10, 7 }
 0x68f   : > { %p1324_p9 = scmp.eq.s32.totalorder %s1321_s20, 0 }
 0x690   : > { %s2034_s21 = sshrl.u32 (!%p1324_p9), %s2103_s10, 3 }
 0x691   : > { %1045 = sbr.rel (%p1324_p9) target bundleno = 1726 (0x6be), region = 48  ;;  %p1325_p13 = scmp.le.s32.totalorder (!%p1324_p9), %s2034_s21, 0 }
 0x698   : > { %1230 = sbr.rel (%p1325_p13) target bundleno = 1705 (0x6a9), region = 128  ;;  %s2096_s18 = smov (!%p1325_p13), %s2028_s17 }
 0x699   : > { %s2097_s23 = smov (!%p1325_p13), %s2007_s15  ;;  %s2043_s14 = smov (!%p1325_p13), 0  }
 0x69a   : > { %s2045_s25 = smov (!%p1325_p13), 0  }
 0x69f LB: >> { %v1121_v37 = vld [vmem:[%s1690_s23] sm:$0xff]  ;;  %v1123_v43 = vld [vmem:[%s1690_s23 + $0x8] sm:$0xff]  ;;  %v1125_v51 = vld [vmem:[%s1690_s23 + $0x10] sm:$0xff]  ;;  %s1137_s26 = sadd.s32 1, %s1694_s14  ;;  %s1115_s25 = sadd.s32 1, %s1698_s25   ;;  %s1698_s25 = sphi %s2045_s25, %s1115_s25   ;;  %s1694_s14 = sphi %s2043_s14, %s2098_s14   ;;  %s1690_s23 = sphi %s2097_s23, %s1142_s23   ;;  %s1686_s18 = sphi %s2096_s18, %s1143_s18  }
 0x6a0   : >> { %1122 = vst [vmem:[%s1686_s18] sm:$0xff] %v1121_v37  ;;  %1124 = vst [vmem:[%s1686_s18 + $0x8] sm:$0xff] %v1123_v43  ;;  %v1127_v53 = vld [vmem:[%s1690_s23 + $0x18] sm:$0xff]  ;;  %v1129_v54 = vld [vmem:[%s1690_s23 + $0x20] sm:$0xff]  ;;  %p1138_p0 = scmp.ge.s32.totalorder %s1137_s26, %s2034_s21  ;;  %p1114_p1 = scmp.ge.s32.totalorder %s1115_s25, %s2034_s21 }
 0x6a1   : >> { %1126 = vst [vmem:[%s1686_s18 + $0x10] sm:$0xff] %v1125_v51  ;;  %v1131_v55 = vld [vmem:[%s1690_s23 + $0x28] sm:$0xff]  ;;  %1128 = vst [vmem:[%s1686_s18 + $0x18] sm:$0xff] %v1127_v53  ;;  %v1133_v56 = vld [vmem:[%s1690_s23 + $0x30] sm:$0xff] }
 0x6a2   : >> { %1130 = vst [vmem:[%s1686_s18 + $0x20] sm:$0xff] %v1129_v54  ;;  %1132 = vst [vmem:[%s1686_s18 + $0x28] sm:$0xff] %v1131_v55  ;;  %v1135_v59 = vld [vmem:[%s1690_s23 + $0x38] sm:$0xff]  ;;  %s2105_s26 = smov (%p1138_p0, %s1137_s26), 0  ;;  %1117 = sbr.rel (!%p1114_p1) target bundleno = 1695 (0x69f), region = 134 }
 0x6a3   : >> { %1134 = vst [vmem:[%s1686_s18 + $0x30] sm:$0xff] %v1133_v56  ;;  %1136 = vst [vmem:[%s1686_s18 + $0x38] sm:$0xff] %v1135_v59  ;;  %s1326_s24 = sshll.u32 %s2105_s26, 6  ;;  %s2098_s14 = smov %s2105_s26 }
 0x6a4   : >> { %s1142_s23 = scalar_lea.vmem %s2007_s15, %s1326_s24 [#allocation4]   ;;  %s1143_s18 = scalar_lea.vmem %s2028_s17, %s1326_s24  }
 0x6a9 PF: > { %s2064_s27 = sand.u32 7, %s2103_s10   ;;  %s1337_s28 = sshll.u32 %s2034_s21, 6 }
 0x6aa   : > { %s1148_s29 = scalar_lea.vmem %s2007_s15, %s1337_s28 [#allocation4]   ;;  %s1150_s30 = scalar_lea.vmem %s2028_s17, %s1337_s28  }
 0x6ab   : > { %p1331_p2 = scmp.le.s32.totalorder %s2064_s27, 0 }
 0x6ac   : > { %s1700_s5 = smov (!%p1331_p2), %s1150_s30   ;;  %s1704_s6 = smov (!%p1331_p2), %s1148_s29  }
 0x6ad   : > { %1244 = sbr.rel (%p1331_p2) target bundleno = 1726 (0x6be), region = 139  ;;  %s1708_s7 = smov (!%p1331_p2), 0  }
 0x6ae   : > { %s1712_s8 = smov (!%p1331_p2), 0  }
 0x6b4 LB: >> { %v1160_v32 = vld [vmem:[%s1706_s6] sm:$0xff]  ;;  %s1162_s9 = sadd.s32 1, %s1710_s7  ;;  %s1154_s8 = sadd.s32 1, %s1714_s8   ;;  %s1714_s8 = sphi %s1712_s8, %s1154_s8   ;;  %s1710_s7 = sphi %s1708_s7, %s1709_s7   ;;  %s1706_s6 = sphi %s1704_s6, %s1167_s6   ;;  %s1702_s5 = sphi %s1700_s5, %s1168_s5  }
 0x6b5   : >> { %1161 = vst [vmem:[%s1702_s5] sm:$0xff] %v1160_v32  ;;  %p1163_p3 = scmp.ge.s32.totalorder %s1162_s9, %s2064_s27  ;;  %p1153_p5 = scmp.ge.s32.totalorder %s1154_s8, %s2064_s27 }
 0x6b7   : >> { %s2107_s9 = smov (%p1163_p3, %s1162_s9), 0  ;;  %1156 = sbr.rel (!%p1153_p5) target bundleno = 1716 (0x6b4), region = 145 }
 0x6b8   : >> { %s1332_s15 = sshll.u32 %s2107_s9, 3  ;;  %s1709_s7 = smov %s2107_s9  }
 0x6b9   : >> { %s1167_s6 = scalar_lea.vmem %s1148_s29, %s1332_s15 [#allocation4]   ;;  %s1168_s5 = scalar_lea.vmem %s1150_s30, %s1332_s15  }
 0x6be PF: > { %p12_p8 = scmp.ge.s32.totalorder %s1759_s19, 4   ;;  %s2099_s15 = smov %s1678_s16 }
 0x6bf   : > { %s2100_s16 = smov %s1767_s22  ;;  %s2101_s17 = smov %s1759_s19 }
 0x6c0   :  { %14 = sbr.rel (!%p12_p8) target bundleno = 2 (0x2), region = 156 }
 0x6c7   :  { %1184 = vsyncpa [#allocation3], 1 }
 0x6c8   :  { %1186 = vsyncpa [#allocation3 + $0x1], 1 }

</bundles_post_ra>
